<compile_context>
chip_gen: v5e
topology: v5e:2x2
jax: 0.10.0
libtpu: 0.0.40
codegen_flags: <defaults>
</compile_context>

<pallas_src>
import jax
import jax.numpy as jnp
from jax.experimental import pallas as pl
from jax.experimental.pallas import tpu as pltpu

HIDDEN1 = 64
HIDDEN2 = 32
OUT_DIM = 2
LANE = 128  # TPU lane width; all feature dims padded to this


def _round_up(x, m):
    return ((x + m - 1) // m) * m


def _pad_cols(a, to):
    pad = to - a.shape[1]
    return jnp.pad(a, ((0, 0), (0, pad))) if pad > 0 else a


def _pad_rows(a, to):
    pad = to - a.shape[0]
    return jnp.pad(a, ((0, pad), (0, 0))) if pad > 0 else a


def trading_nn_kernel(x_ref, w1_ref, b1_ref, w2_ref, b2_ref, w3_ref, b3_ref, o_ref):
    # fc1 + ReLU   : (TB, in) @ (in, 128) -> (TB, 128)
    h1 = jnp.dot(x_ref[...], w1_ref[...], preferred_element_type=jnp.float32)
    h1 = jnp.maximum(h1 + b1_ref[...], 0.0)
    # fc2 + ReLU   : (TB, 128) @ (128, 128) -> (TB, 128)
    h2 = jnp.dot(h1, w2_ref[...], preferred_element_type=jnp.float32)
    h2 = jnp.maximum(h2 + b2_ref[...], 0.0)
    # fc3 (no act) : (TB, 128) @ (128, 128) -> (TB, 128), lane-dense store
    out = jnp.dot(h2, w3_ref[...], preferred_element_type=jnp.float32) + b3_ref[...]
    o_ref[...] = out.astype(o_ref.dtype)


def init_params(key, input_size):
    """Logical (unpadded) parameters, stored as (in, out) weights."""
    ks = jax.random.split(key, 6)
    w1 = jax.random.normal(ks[0], (input_size, HIDDEN1), jnp.float32) * 0.1
    b1 = jax.random.normal(ks[1], (1, HIDDEN1), jnp.float32) * 0.1
    w2 = jax.random.normal(ks[2], (HIDDEN1, HIDDEN2), jnp.float32) * 0.1
    b2 = jax.random.normal(ks[3], (1, HIDDEN2), jnp.float32) * 0.1
    w3 = jax.random.normal(ks[4], (HIDDEN2, OUT_DIM), jnp.float32) * 0.1
    b3 = jax.random.normal(ks[5], (1, OUT_DIM), jnp.float32) * 0.1
    return dict(w1=w1, b1=b1, w2=w2, b2=b2, w3=w3, b3=b3)


def pad_params(p):
    """Zero-pad weights/biases to 128-lane aligned shapes (numerically exact)."""
    w1 = _pad_cols(p["w1"], LANE)                    # (in,  128)
    b1 = _pad_cols(p["b1"], LANE)                    # (1,   128)
    w2 = _pad_cols(_pad_rows(p["w2"], LANE), LANE)   # (128, 128)
    b2 = _pad_cols(p["b2"], LANE)                    # (1,   128)
    w3 = _pad_cols(_pad_rows(p["w3"], LANE), LANE)   # (128, 128)
    b3 = _pad_cols(p["b3"], LANE)                    # (1,   128)
    return w1, b1, w2, b2, w3, b3


def trading_nn_forward(x, params, *, tb_max=512):
    """x: (B, input_size) float32. Returns (B, 2) float32."""
    w1, b1, w2, b2, w3, b3 = pad_params(params)
    B, in_dim = x.shape

    # Batch tile: multiple of 8 sublanes, capped at tb_max (~512 hits ~85% of
    # HBM roofline for this mem-bound kernel while staying tiny in VMEM).
    tb = min(tb_max, _round_up(B, 8))
    b_pad = _round_up(B, tb)
    if b_pad != B:
        x = jnp.pad(x, ((0, b_pad - B), (0, 0)))

    grid = (b_pad // tb,)

    flops = 2 * b_pad * (in_dim * LANE + LANE * LANE + LANE * LANE)
    weight_bytes = 4 * sum(int(a.size) for a in (w1, b1, w2, b2, w3, b3))
    bytes_accessed = 4 * (b_pad * in_dim + b_pad * LANE) + weight_bytes

    out_padded = pl.pallas_call(
        trading_nn_kernel,
        out_shape=jax.ShapeDtypeStruct((b_pad, LANE), jnp.float32),
        grid=grid,
        in_specs=[
            pl.BlockSpec((tb, in_dim), lambda i: (i, 0)),     # x: tiled over batch
            pl.BlockSpec(w1.shape, lambda i: (0, 0)),          # weights/biases:
            pl.BlockSpec(b1.shape, lambda i: (0, 0)),          # constant index_map
            pl.BlockSpec(w2.shape, lambda i: (0, 0)),          # -> resident in VMEM
            pl.BlockSpec(b2.shape, lambda i: (0, 0)),          #    across grid steps
            pl.BlockSpec(w3.shape, lambda i: (0, 0)),
            pl.BlockSpec(b3.shape, lambda i: (0, 0)),
        ],
        out_specs=pl.BlockSpec((tb, LANE), lambda i: (i, 0)),  # lane-dense output
        compiler_params=pltpu.CompilerParams(
            dimension_semantics=("parallel",),                 # megacore on v7x
            vmem_limit_bytes=32 * 1024 * 1024,
        ),
        cost_estimate=pl.CostEstimate(
            flops=flops, transcendentals=0, bytes_accessed=bytes_accessed
        ),
    )(x, w1, b1, w2, b2, w3, b3)

    # Strip batch padding and the 126 zero lanes of output padding.
    return out_padded[:B, :OUT_DIM]
    # TODO(synk): optionally cast x/weights to bf16 (f32 accumulate) on
    # v6e/v7x to halve the dominant x HBM stream; kept f32 here for exactness.


def reference_forward(x, p):
    h1 = jnp.maximum(x @ p["w1"] + p["b1"], 0.0)
    h2 = jnp.maximum(h1 @ p["w2"] + p["b2"], 0.0)
    return h2 @ p["w3"] + p["b3"]


if __name__ == "__main__":
    key = jax.random.PRNGKey(0)
    k_x, k_p = jax.random.split(key)

    batch = 30          # non-multiple of the tile -> exercises batch padding
    input_size = 16     # number of trading features

    x = jax.random.normal(k_x, (batch, input_size), jnp.float32)
    params = init_params(k_p, input_size)

    # Small tb_max so the small test batch still runs a multi-step grid
    # (production default tb_max=512).
    out = trading_nn_forward(x, params, tb_max=8)
    out = jax.block_until_ready(out)

    ref = reference_forward(x, params)
    assert out.shape == (batch, OUT_DIM)
    assert jnp.allclose(out, ref, atol=1e-4, rtol=1e-4)

    print("KERNEL_OK")
</pallas_src>

<mosaic_0001>
module attributes {stable_mosaic.version = 11 : i64} {
  func.func @trading_nn_kernel(%arg0: i32, %arg1: memref<8x16xf32, #tpu.memory_space<vmem>>, %arg2: memref<16x128xf32, #tpu.memory_space<vmem>>, %arg3: memref<1x128xf32, #tpu.memory_space<vmem>>, %arg4: memref<128x128xf32, #tpu.memory_space<vmem>>, %arg5: memref<1x128xf32, #tpu.memory_space<vmem>>, %arg6: memref<128x128xf32, #tpu.memory_space<vmem>>, %arg7: memref<1x128xf32, #tpu.memory_space<vmem>>, %arg8: memref<8x128xf32, #tpu.memory_space<vmem>>) attributes {dimension_semantics = [#tpu.dimension_semantics<parallel>], iteration_bounds = array<i64: 4>, scalar_prefetch = 0 : i64, scratch_operands = 0 : i64, tpu.core_type = #tpu.core_type<tc>, window_params = [{transform_indices = @transform_0, window_bounds = array<i64: 8, 16>}, {pipeline_mode = #tpu.pipeline_mode<synchronous>, transform_indices = @transform_1, window_bounds = array<i64: 16, 128>}, {pipeline_mode = #tpu.pipeline_mode<synchronous>, transform_indices = @transform_2, window_bounds = array<i64: 1, 128>}, {pipeline_mode = #tpu.pipeline_mode<synchronous>, transform_indices = @transform_3, window_bounds = array<i64: 128, 128>}, {pipeline_mode = #tpu.pipeline_mode<synchronous>, transform_indices = @transform_4, window_bounds = array<i64: 1, 128>}, {pipeline_mode = #tpu.pipeline_mode<synchronous>, transform_indices = @transform_5, window_bounds = array<i64: 128, 128>}, {pipeline_mode = #tpu.pipeline_mode<synchronous>, transform_indices = @transform_6, window_bounds = array<i64: 1, 128>}, {transform_indices = @transform_7, window_bounds = array<i64: 8, 128>}]} {
    %c0 = arith.constant 0 : index
    %c0_0 = arith.constant 0 : index
    %0 = vector.load %arg1[%c0, %c0_0] : memref<8x16xf32, #tpu.memory_space<vmem>>, vector<8x16xf32>
    %c0_1 = arith.constant 0 : index
    %c0_2 = arith.constant 0 : index
    %1 = vector.load %arg2[%c0_1, %c0_2] : memref<16x128xf32, #tpu.memory_space<vmem>>, vector<16x128xf32>
    %cst = arith.constant dense<0.000000e+00> : vector<8x128xf32>
    %2 = tpu.matmul %0, %1, %cst {dimension_numbers = #tpu.dot_dimension_numbers<[1], [0], [0], [1], [0, 0, 1, 1], [], []>} : vector<8x16xf32>, vector<16x128xf32>, vector<8x128xf32> -> vector<8x128xf32>
    %c0_3 = arith.constant 0 : index
    %c0_4 = arith.constant 0 : index
    %3 = vector.load %arg3[%c0_3, %c0_4] : memref<1x128xf32, #tpu.memory_space<vmem>>, vector<1x128xf32>
    %4 = vector.broadcast %3 : vector<1x128xf32> to vector<8x128xf32>
    %5 = arith.addf %2, %4 : vector<8x128xf32>
    %cst_5 = arith.constant 0.000000e+00 : f32
    %6 = vector.broadcast %cst_5 : f32 to vector<8x128xf32>
    %7 = arith.maximumf %5, %6 : vector<8x128xf32>
    %c0_6 = arith.constant 0 : index
    %c0_7 = arith.constant 0 : index
    %8 = vector.load %arg4[%c0_6, %c0_7] : memref<128x128xf32, #tpu.memory_space<vmem>>, vector<128x128xf32>
    %cst_8 = arith.constant dense<0.000000e+00> : vector<8x128xf32>
    %9 = tpu.matmul %7, %8, %cst_8 {dimension_numbers = #tpu.dot_dimension_numbers<[1], [0], [0], [1], [0, 0, 1, 1], [], []>} : vector<8x128xf32>, vector<128x128xf32>, vector<8x128xf32> -> vector<8x128xf32>
    %c0_9 = arith.constant 0 : index
    %c0_10 = arith.constant 0 : index
    %10 = vector.load %arg5[%c0_9, %c0_10] : memref<1x128xf32, #tpu.memory_space<vmem>>, vector<1x128xf32>
    %11 = vector.broadcast %10 : vector<1x128xf32> to vector<8x128xf32>
    %12 = arith.addf %9, %11 : vector<8x128xf32>
    %cst_11 = arith.constant 0.000000e+00 : f32
    %13 = vector.broadcast %cst_11 : f32 to vector<8x128xf32>
    %14 = arith.maximumf %12, %13 : vector<8x128xf32>
    %c0_12 = arith.constant 0 : index
    %c0_13 = arith.constant 0 : index
    %15 = vector.load %arg6[%c0_12, %c0_13] : memref<128x128xf32, #tpu.memory_space<vmem>>, vector<128x128xf32>
    %cst_14 = arith.constant dense<0.000000e+00> : vector<8x128xf32>
    %16 = tpu.matmul %14, %15, %cst_14 {dimension_numbers = #tpu.dot_dimension_numbers<[1], [0], [0], [1], [0, 0, 1, 1], [], []>} : vector<8x128xf32>, vector<128x128xf32>, vector<8x128xf32> -> vector<8x128xf32>
    %c0_15 = arith.constant 0 : index
    %c0_16 = arith.constant 0 : index
    %17 = vector.load %arg7[%c0_15, %c0_16] : memref<1x128xf32, #tpu.memory_space<vmem>>, vector<1x128xf32>
    %18 = vector.broadcast %17 : vector<1x128xf32> to vector<8x128xf32>
    %19 = arith.addf %16, %18 : vector<8x128xf32>
    %c0_17 = arith.constant 0 : index
    %c0_18 = arith.constant 0 : index
    %20 = vector.load %arg8[%c0_17, %c0_18] : memref<8x128xf32, #tpu.memory_space<vmem>>, vector<8x128xf32>
    tpu.vector_store %arg8[%c0_17, %c0_18], %19 {strides = array<i32>} : memref<8x128xf32, #tpu.memory_space<vmem>>, vector<8x128xf32>,
    return
  }
  func.func @transform_0(%arg0: i32) -> (i32, i32) {
    %c0_i32 = arith.constant 0 : i32
    %c0_i32_0 = arith.constant 0 : i32
    return %arg0, %c0_i32 : i32, i32
  }
  func.func @transform_1(%arg0: i32) -> (i32, i32) {
    %c0_i32 = arith.constant 0 : i32
    %c0_i32_0 = arith.constant 0 : i32
    %c0_i32_1 = arith.constant 0 : i32
    return %c0_i32, %c0_i32_0 : i32, i32
  }
  func.func @transform_2(%arg0: i32) -> (i32, i32) {
    %c0_i32 = arith.constant 0 : i32
    %c0_i32_0 = arith.constant 0 : i32
    %c0_i32_1 = arith.constant 0 : i32
    return %c0_i32, %c0_i32_0 : i32, i32
  }
  func.func @transform_3(%arg0: i32) -> (i32, i32) {
    %c0_i32 = arith.constant 0 : i32
    %c0_i32_0 = arith.constant 0 : i32
    %c0_i32_1 = arith.constant 0 : i32
    return %c0_i32, %c0_i32_0 : i32, i32
  }
  func.func @transform_4(%arg0: i32) -> (i32, i32) {
    %c0_i32 = arith.constant 0 : i32
    %c0_i32_0 = arith.constant 0 : i32
    %c0_i32_1 = arith.constant 0 : i32
    return %c0_i32, %c0_i32_0 : i32, i32
  }
  func.func @transform_5(%arg0: i32) -> (i32, i32) {
    %c0_i32 = arith.constant 0 : i32
    %c0_i32_0 = arith.constant 0 : i32
    %c0_i32_1 = arith.constant 0 : i32
    return %c0_i32, %c0_i32_0 : i32, i32
  }
  func.func @transform_6(%arg0: i32) -> (i32, i32) {
    %c0_i32 = arith.constant 0 : i32
    %c0_i32_0 = arith.constant 0 : i32
    %c0_i32_1 = arith.constant 0 : i32
    return %c0_i32, %c0_i32_0 : i32, i32
  }
  func.func @transform_7(%arg0: i32) -> (i32, i32) {
    %c0_i32 = arith.constant 0 : i32
    %c0_i32_0 = arith.constant 0 : i32
    return %arg0, %c0_i32 : i32, i32
  }
}

</mosaic_0001>

<bundles_post_ra>
// kernel: tpu_custom_call.1
= control target key start
LH: loop header
LB: loop body
LE: loop exit
PB: predicated region body
PF: predicated region fallthrough
CT: control target
= control target key end

     0   :  { %12 = vsyncpa [#allocation3], 0  ;;  %s900_s0 = inlined_call_operand.vmem [shape: f32[32,16], index: 0, kind: input, shape index: {}]   ;;  %s901_s1 = inlined_call_operand.vmem [shape: f32[16,128], index: 1, kind: input, shape index: {}]   ;;  %s902_s2 = inlined_call_operand.vmem [shape: f32[1,128], index: 2, kind: input, shape index: {}]   ;;  %s903_s3 = inlined_call_operand.hbm [shape: f32[128,128], index: 3, kind: input, shape index: {}]   ;;  %s904_s4 = inlined_call_operand.vmem [shape: f32[1,128], index: 4, kind: input, shape index: {}]   ;;  %s905_s5 = inlined_call_operand.hbm [shape: f32[128,128], index: 5, kind: input, shape index: {}]   ;;  %s906_s6 = inlined_call_operand.vmem [shape: f32[1,128], index: 6, kind: input, shape index: {}]   ;;  %s907_s7 = inlined_call_operand.hbm [shape: f32[32,128], index: 7, kind: output, shape index: {}]  }
   0x1   :  { %13 = vsyncpa [#allocation6], 0 }
   0x2   :  { %14 = vsyncpa [#allocation4], 0 }
   0x3   :  { %16 = vsyncpa [#allocation4 + $0x1], 0  ;;  %s775_s24 = smov 0   ;;  %s777_s25 = smov 0  }
   0x4   :  { %s779_s26 = smov 0   ;;  %s781_s27 = smov 0  }
   0x5 LB: > { %s796_s28 = sadd.s32 4294967295, %s729_s27   ;;  %s519_s29 = sadd.s32 4294967294, %s729_s27   ;;  %s729_s27 = sphi %s781_s27, %s914_s27   ;;  %s725_s26 = sphi %s779_s26, %s913_s26   ;;  %s721_s25 = sphi %s777_s25, %s912_s25   ;;  %s717_s24 = sphi %s775_s24, %s911_s24  }
   0x6   : > { %s800_s30 = sadd.s32 1, %s729_s27   ;;  %s181_s8 = sadd.s32 1, %s725_s26 }
   0x7   : > { %s178_s9 = ssub.s32 %s729_s27, %s800_s30  ;;  %p191_p0 = scmp.ne.s32.totalorder %s725_s26, %s721_s25 }
   0x8   : > { %p179_p1 = scmp.eq.s32.totalorder %s178_s9, 0  ;;  %p192_p2 = scmp.eq.s32.totalorder %s796_s28, 3 }
   0x9   : > { %p197_p3 = scmp.ne.s32.totalorder %s721_s25, %s717_s24  ;;  %p198_p4 = scmp.eq.s32.totalorder %s519_s29, 3 }
   0xa   : > { %s811_s10 = scalar_select %p179_p1, %s725_s26, %s181_s8  }
   0xb   : > { %p813_p5 = por %p192_p2, %p191_p0  ;;  %p817_p6 = por %p198_p4, %p197_p3 }
   0xc   : > { %p520_p7 = scmp.ge.s32.totalorder %s729_s27, 1  ;;  %p205_p8 = scmp.lt.s32.totalorder %s729_s27, 5 }
   0xd   : > { %p555_p9 = scmp.eq.s32.totalorder %s796_s28, 0  ;;  %s222_s16 = sshll.u32 %s903_s3, 4  ;;  %s223_s16 = int_to_ptr.hbm [resolvable:$true] %s222_s16 }
   0xe   : > { %p824_p10 = pnand %p520_p7, %p205_p8  ;;  %s731_s17 = smov [#allocation2]  }
   0xf   : > { %s224_s18 = sshll.u32 %s731_s17, 4  ;;  %s239_s21 = sshll.u32 %s905_s5, 4  ;;  %s225_s18 = int_to_ptr.vmem [resolvable:$true] %s224_s18  ;;  %s240_s21 = int_to_ptr.hbm [resolvable:$true] %s239_s21 }
  0x10   : > { %p544_p11 = pneg %p824_p10  ;;  %s732_s22 = smov 128  }
  0x11   : > { %s733_s23 = smov 8   ;;  %s734_s29 = smov [#allocation5]  }
  0x12   : > { %p545_p12 = pnand %p555_p9, %p544_p11  ;;  %s241_s8 = sshll.u32 %s734_s29, 4  ;;  %s242_s8 = int_to_ptr.vmem [resolvable:$true] %s241_s8 }
  0x13   : > { %267 = sbr.rel (%p824_p10) target bundleno = 431 (0x1af), region = 48 }
  0x14   : > { %547 = dma.hbm_to_vmem [thread:$0]  (!%p545_p12), %s223_s16, 2048, %s225_s18, [#allocation3], %s732_s22, %s732_s22, %s733_s23  }
  0x15   : > { %550 = dma.hbm_to_vmem [thread:$0]  (!%p545_p12), %s240_s21, 2048, %s242_s8, [#allocation6], %s732_s22, %s732_s22, %s733_s23  }
  0x18   : > { %704 = dma.done.wait (%p555_p9), [#allocation3], 2048  }
  0x19   : > { %706 = vsyncadd (%p555_p9), [#allocation3], 4294965248 }
  0x1a   : > { %708 = dma.done.wait (%p555_p9), [#allocation6], 2048  }
  0x1b   : > { %710 = vsyncadd (%p555_p9), [#allocation6], 4294965248  ;;  %p304_p13 = scmp.lt.s32.totalorder %s796_s28, 3  ;;  %v310_v0 = vld [vmem:[%s901_s1 + $0x8] sm:$0xff]  ;;  %v309_v1 = vld [vmem:[%s901_s1] sm:$0xff]  ;;  %vm315_vm0 = vcmask 130048  }
  0x1c   : > { %333 = vmatpush.msra.mxu0 %v310_v0  ;;  %v355_v3 = vld [vmem:[#allocation2 + $0x78] sm:$0xff]  ;;  %v354_v4 = vld [vmem:[#allocation2 + $0x70] sm:$0xff]  ;;  %v353_v5 = vld [vmem:[#allocation2 + $0x68] sm:$0xff]  ;;  %s301_s8 = sand.u32 1, %s721_s25   ;;  %s679_s15 = scalar_lea.hbm %s907_s7, 32 }
  0x1d   : > { %s305_s9 = scalar_select %p304_p13, %s796_s28, 3  ;;  %360 = vmatpush.msra.mxu1 %v355_v3  ;;  %v352_v6 = vld [vmem:[#allocation2 + $0x60] sm:$0xff]  ;;  %v351_v7 = vld [vmem:[#allocation2 + $0x58] sm:$0xff]  ;;  %v350_v8 = vld [vmem:[#allocation2 + $0x50] sm:$0xff] }
  0x1e   : > { %334 = vmatpush.msra.mxu0 %v309_v1  ;;  %v349_v9 = vld [vmem:[#allocation2 + $0x48] sm:$0xff]  ;;  %v348_v10 = vld [vmem:[#allocation2 + $0x40] sm:$0xff]  ;;  %v347_v11 = vld [vmem:[#allocation2 + $0x38] sm:$0xff]  ;;  %s423_s22 = scalar_lea.sflag [#allocation4], %s301_s8 }
  0x1f   : > { %s528_s14 = sshll.u32 %s305_s9, 3  ;;  %361 = vmatpush.msra.mxu1 %v354_v4  ;;  %v346_v12 = vld [vmem:[#allocation2 + $0x30] sm:$0xff]  ;;  %v345_v13 = vld [vmem:[#allocation2 + $0x28] sm:$0xff]  ;;  %v344_v14 = vld [vmem:[#allocation2 + $0x20] sm:$0xff]  ;;  %s527_s9 = sshll.u32 %s301_s8, 3 }
  0x20   : > { %s307_s16 = scalar_lea.vmem %s900_s0, %s528_s14  ;;  %v343_v15 = vld [vmem:[#allocation2 + $0x18] sm:$0xff]  ;;  %v342_v16 = vld [vmem:[#allocation2 + $0x10] sm:$0xff]  ;;  %v341_v17 = vld [vmem:[#allocation2 + $0x8] sm:$0xff]  ;;  %s531_s14 = sshll.u32 %s796_s28, 3 }
  0x21   : > { %v308_v2 = vld [vmem:[%s307_s16] sm:$0xff]  ;;  %362 = vmatpush.msra.mxu1 %v353_v5  ;;  %v396_v19 = vld [vmem:[#allocation5 + $0x78] sm:$0xff]  ;;  %v395_v20 = vld [vmem:[#allocation5 + $0x70] sm:$0xff]  ;;  %s433_s16 = scalar_lea.hbm %s907_s7, %s531_s14  ;;  %s303_s19 = scalar_lea.vmem [#allocation7], %s527_s9 }
  0x22   : > { %529 = vmatmul.msk.f32.vlgmr.msra.gmra.mxu0 %vm315_vm0, %v308_v2  ;;  %v340_v18 = vld [vmem:[#allocation2] sm:$0xff]  ;;  %401 = vmatpush.msra.mxu2 %v396_v19  ;;  %v394_v21 = vld [vmem:[#allocation5 + $0x68] sm:$0xff]  ;;  %v392_v23 = vld [vmem:[#allocation5 + $0x58] sm:$0xff]  ;;  %s435_s20 = sshll.u32 %s303_s19, 4  ;;  %s437_s21 = sshll.u32 %s433_s16, 4  ;;  %s436_s20 = int_to_ptr.vmem [resolvable:$true] %s435_s20  ;;  %s438_s21 = int_to_ptr.hbm [resolvable:$true] %s437_s21 }
  0x23   : > { %363 = vmatpush.msra.mxu1 %v352_v6  ;;  %v393_v22 = vld [vmem:[#allocation5 + $0x60] sm:$0xff]  ;;  %v391_v24 = vld [vmem:[#allocation5 + $0x50] sm:$0xff]  ;;  %v390_v25 = vld [vmem:[#allocation5 + $0x48] sm:$0xff]  ;;  %s673_s23 = sshra.s32 %s438_s21, 4  ;;  %s674_s23 = int_to_ptr.hbm [resolvable:$true] %s673_s23 }
  0x24   : > { %402 = vmatpush.msra.mxu2 %v395_v20  ;;  %v389_v26 = vld [vmem:[#allocation5 + $0x40] sm:$0xff]  ;;  %v388_v27 = vld [vmem:[#allocation5 + $0x38] sm:$0xff]  ;;  %v387_v28 = vld [vmem:[#allocation5 + $0x30] sm:$0xff]  ;;  %s675_s28 = scalar_lea.hbm %s674_s23, 8  ;;  %p680_p3 = scmp.lt.s32.totalorder %s674_s23, %s907_s7 }
  0x25   : > { %364 = vmatpush.msra.mxu1 %v351_v7  ;;  %v386_v29 = vld [vmem:[#allocation5 + $0x28] sm:$0xff]  ;;  %v385_v30 = vld [vmem:[#allocation5 + $0x20] sm:$0xff]  ;;  %v384_v31 = vld [vmem:[#allocation5 + $0x18] sm:$0xff]  ;;  %p676_p0 = scmp.ne.s32.totalorder %s674_s23, %s675_s28  ;;  %p681_p4 = scmp.lt.s32.totalorder %s679_s15, %s675_s28 }
  0x26   : > { %403 = vmatpush.msra.mxu2 %v394_v21  ;;  %v596_v32 = vld [vmem:[%s902_s2] ss:$0 sm:$0xff]  ;;  %v383_v36 = vld [vmem:[#allocation5 + $0x10] sm:$0xff]  ;;  %v382_v37 = vld [vmem:[#allocation5 + $0x8] sm:$0xff] }
  0x27   : > { %365 = vmatpush.msra.mxu1 %v350_v8  ;;  %v381_v38 = vld [vmem:[#allocation5] sm:$0xff]  ;;  %p677_p1 = pnand %p676_p0, %p813_p5  ;;  %p682_p7 = por %p681_p4, %p680_p3 }
  0x28   : > { %404 = vmatpush.msra.mxu2 %v393_v22  ;;  %v597_v39 = vld [vmem:[%s904_s4] ss:$0 sm:$0xff] }
  0x29   : > { %366 = vmatpush.msra.mxu1 %v349_v9  ;;  %v598_v43 = vld [vmem:[%s906_s6] ss:$0 sm:$0xff]  ;;  %p678_p2 = pneg %p677_p1 }
  0x2a   : > { %405 = vmatpush.msra.mxu2 %v392_v23 }
  0x2b   : > { %367 = vmatpush.msra.mxu1 %v348_v10  ;;  %p683_p8 = pnand %p682_p7, %p678_p2 }
  0x2c   : > { %406 = vmatpush.msra.mxu2 %v391_v24 }
  0x2d   : > { %368 = vmatpush.msra.mxu1 %v347_v11 }
  0x2e   : > { %407 = vmatpush.msra.mxu2 %v390_v25 }
  0x2f   : > { %369 = vmatpush.msra.mxu1 %v346_v12 }
  0x30   : > { %408 = vmatpush.msra.mxu2 %v389_v26 }
  0x31   : > { %370 = vmatpush.msra.mxu1 %v345_v13 }
  0x32   : > { %409 = vmatpush.msra.mxu2 %v388_v27 }
  0x33   : > { %371 = vmatpush.msra.mxu1 %v344_v14 }
  0x34   : > { %410 = vmatpush.msra.mxu2 %v387_v28 }
  0x35   : > { %372 = vmatpush.msra.mxu1 %v343_v15 }
  0x36   : > { %411 = vmatpush.msra.mxu2 %v386_v29 }
  0x37   : > { %373 = vmatpush.msra.mxu1 %v342_v16 }
  0x38   : > { %412 = vmatpush.msra.mxu2 %v385_v30 }
  0x39   : > { %374 = vmatpush.msra.mxu1 %v341_v17 }
  0x3a   : > { %413 = vmatpush.msra.mxu2 %v384_v31 }
  0x3b   : > { %375 = vmatpush.msra.mxu1 %v340_v18 }
  0x3c   : > { %414 = vmatpush.msra.mxu2 %v383_v36 }
  0x3e   : > { %415 = vmatpush.msra.mxu2 %v382_v37 }
  0x40   : > { %416 = vmatpush.msra.mxu2 %v381_v38 }
  0x9f   : > { %v336_v33 = vpop.f32.mrf.mxu0 }
  0xa0   : > { %v337_v34 = vadd.f32 %v596_v32, %v336_v33 }
  0xa2   : > { %v339_v35 = vmax.f32 %v337_v34, 0.0 }
  0xa4   : > { %376 = vmatmul.f32.vlgmr.msra.gmra.mxu1 %v339_v35 }
 0x121   : > { %v377_v40 = vpop.f32.mrf.mxu1 }
 0x122   : > { %v378_v41 = vadd.f32 %v597_v39, %v377_v40 }
 0x124   : > { %v380_v42 = vmax.f32 %v378_v41, 0.0 }
 0x126   : > { %417 = vmatmul.f32.vlgmr.msra.gmra.mxu2 %v380_v42 }
 0x1a9   : > { %v418_v44 = vpop.f32.mrf.mxu2 }
 0x1aa   : > { %v419_v45 = vadd.f32 %v598_v43, %v418_v44 }
 0x1ac   : > { %421 = vst [vmem:[%s303_s19] sm:$0xff] %v419_v45 }
 0x1ad   : > { %686 = shalt.err (!%p683_p8)
}
 0x1ae   : > { %542 = dma.vmem_to_hbm [thread:$0]  (%p813_p5), %s436_s20, 128, %s438_s21, %s423_s22  }
 0x1af PF: > { %p559_p9 = scmp.ge.s32.totalorder %s729_s27, 2  ;;  %s449_s8 = sand.u32 1, %s717_s24  }
 0x1b0   : > { %s450_s16 = scalar_lea.sflag [#allocation4], %s449_s8 }
 0x1b1   : > { %p552_p10 = pnand %p559_p9, %p817_p6 }
 0x1b3   : > { %p553_p11 = pneg %p552_p10 }
 0x1b5   : > { %712 = dma.done.wait (%p553_p11), %s450_s16, 128  }
 0x1b6   : > { %714 = vsyncadd (%p553_p11), %s450_s16, 4294967168  ;;  %p19_p12 = scmp.ge.s32.totalorder %s800_s30, 6   ;;  %s911_s24 = smov %s721_s25 }
 0x1b7   : > { %s912_s25 = smov %s725_s26  ;;  %s913_s26 = smov %s811_s10 }
 0x1b8   : > { %s914_s27 = smov %s800_s30  ;;  %21 = sbr.rel (!%p19_p12) target bundleno = 5 (0x5), region = 92 }
 0x1bd   :  { %456 = vsyncpa [#allocation3], 1 }
 0x1be   :  { %458 = vsyncpa [#allocation3 + $0x1], 1 }
 0x1bf   :  { %459 = vsyncpa [#allocation6], 1 }
 0x1c0   :  { %460 = vsyncpa [#allocation4], 1 }
 0x1c1   :  { %462 = vsyncpa [#allocation4 + $0x1], 1 }

</bundles_post_ra>
